<compile_context>
chip_gen: v7x
topology: tpu7x:2x2x1
jax: 0.10.0
libtpu: 0.0.40
codegen_flags: <defaults>
</compile_context>

<pallas_src>
import jax
import jax.numpy as jnp
from jax.experimental import pallas as pl
from jax.experimental.pallas import tpu as pltpu

_LANE = 128


def _svm_kernel(x_ref, w_ref, b_ref, o_ref):
    # MXU matmul (bf16 in, f32 accumulate) + VPU bias add.
    acc = jnp.dot(x_ref[...], w_ref[...], preferred_element_type=jnp.float32)
    o_ref[...] = acc + b_ref[...]


def svm_forward(x, weight, bias, *, input_size=28, tile_b=512):
    """Pallas forward pass of the SVM module.

    x:      any shape whose trailing elements flatten to input_size**2 per row
    weight: (num_classes, input_size**2)   -- PyTorch nn.Linear convention
    bias:   (num_classes,)
    """
    K = input_size * input_size
    x2d = x.reshape(-1, K)
    B = x2d.shape[0]
    N = weight.shape[0]

    # Lane-pad the class dimension to a full 128-lane vreg width.
    N_pad = max(_LANE, ((N + _LANE - 1) // _LANE) * _LANE)

    # bf16 operands for the MXU; bias / output stay f32.
    x_bf16 = x2d.astype(jnp.bfloat16)
    w_pad = jnp.zeros((K, N_pad), jnp.bfloat16).at[:, :N].set(
        weight.T.astype(jnp.bfloat16))
    b_pad = jnp.zeros((1, N_pad), jnp.float32).at[:, :N].set(
        bias.reshape(1, N).astype(jnp.float32))

    # Batch tile: large enough to amortize per-step overhead, multiple of 16
    # (bf16 sublane packing), capped at 2048 so the double-buffered x tile
    # stays well inside v7x's scoped VMEM. Don't over-pad tiny batches.
    tile_b = max(16, min(int(tile_b), 2048))
    tile_b = (tile_b // 16) * 16
    tile_b = min(tile_b, ((B + 15) // 16) * 16)

    B_pad = ((B + tile_b - 1) // tile_b) * tile_b
    if B_pad != B:
        x_bf16 = jnp.pad(x_bf16, ((0, B_pad - B), (0, 0)))

    grid = (B_pad // tile_b,)

    cost = pl.CostEstimate(
        flops=2 * B_pad * K * N_pad,
        transcendentals=0,
        bytes_accessed=(B_pad * K * 2          # bf16 x read
                        + K * N_pad * 2        # bf16 weight read
                        + N_pad * 4            # f32 bias read
                        + B_pad * N_pad * 4),  # f32 output write
    )

    out = pl.pallas_call(
        _svm_kernel,
        out_shape=jax.ShapeDtypeStruct((B_pad, N_pad), jnp.float32),
        grid_spec=pltpu.PrefetchScalarGridSpec(
            num_scalar_prefetch=0,
            grid=grid,
            in_specs=[
                # x tile: (tile_b, K); K kept whole (784*bf16 is tiny in VMEM).
                pl.BlockSpec((tile_b, K), lambda i: (i, 0)),
                # Full (lane-padded) weight resident every step.
                pl.BlockSpec((K, N_pad), lambda i: (0, 0)),
                # Full (lane-padded) bias resident every step.
                pl.BlockSpec((1, N_pad), lambda i: (0, 0)),
            ],
            out_specs=pl.BlockSpec((tile_b, N_pad), lambda i: (i, 0)),
        ),
        compiler_params=pltpu.CompilerParams(
            dimension_semantics=("parallel",),
        ),
        cost_estimate=cost,
    )(x_bf16, w_pad, b_pad)

    # Strip batch padding and the lane padding of the class dim.
    return out[:B, :N]


def init_svm_params(key, input_size=28, num_classes=10):
    """Deterministic init mirroring nn.Linear's default (uniform +/- 1/sqrt(fan_in))."""
    K = input_size * input_size
    kw, kb = jax.random.split(key)
    bound = 1.0 / jnp.sqrt(jnp.float32(K))
    weight = jax.random.uniform(kw, (num_classes, K), jnp.float32, -bound, bound)
    bias = jax.random.uniform(kb, (num_classes,), jnp.float32, -bound, bound)
    return weight, bias


if __name__ == "__main__":
    key = jax.random.PRNGKey(0)
    k_x, k_p = jax.random.split(key)

    input_size = 28
    num_classes = 10
    batch = 8

    # NCHW-style input, like an MNIST batch: (B, 1, 28, 28)
    x = jax.random.normal(k_x, (batch, 1, input_size, input_size), jnp.float32)
    weight, bias = init_svm_params(k_p, input_size, num_classes)

    y = svm_forward(x, weight, bias, input_size=input_size)
    jax.block_until_ready(y)

    # Reference check against plain JAX (same math as the PyTorch module).
    # Tolerance accounts for the bf16 cast of x / W (f32 accumulation on MXU).
    y_ref = x.reshape(-1, input_size * input_size) @ weight.T + bias
    assert y.shape == (batch, num_classes)
    assert jnp.allclose(y, y_ref, atol=5e-2, rtol=5e-2)

    print("KERNEL_OK")
</pallas_src>

<mosaic_0001>
module attributes {stable_mosaic.version = 11 : i64} {
  func.func @_svm_kernel(%arg0: i32, %arg1: memref<16x784xbf16, #tpu.memory_space<vmem>>, %arg2: memref<784x128xbf16, #tpu.memory_space<vmem>>, %arg3: memref<1x128xf32, #tpu.memory_space<vmem>>, %arg4: memref<16x128xf32, #tpu.memory_space<vmem>>) attributes {dimension_semantics = [#tpu.dimension_semantics<parallel>], iteration_bounds = array<i64: 1>, scalar_prefetch = 0 : i64, scratch_operands = 0 : i64, tpu.core_type = #tpu.core_type<tc>, window_params = [{transform_indices = @transform_0, window_bounds = array<i64: 16, 784>}, {pipeline_mode = #tpu.pipeline_mode<synchronous>, transform_indices = @transform_1, window_bounds = array<i64: 784, 128>}, {pipeline_mode = #tpu.pipeline_mode<synchronous>, transform_indices = @transform_2, window_bounds = array<i64: 1, 128>}, {transform_indices = @transform_3, window_bounds = array<i64: 16, 128>}]} {
    %c0 = arith.constant 0 : index
    %c0_0 = arith.constant 0 : index
    %0 = vector.load %arg1[%c0, %c0_0] : memref<16x784xbf16, #tpu.memory_space<vmem>>, vector<16x784xbf16>
    %c0_1 = arith.constant 0 : index
    %c0_2 = arith.constant 0 : index
    %1 = vector.load %arg2[%c0_1, %c0_2] : memref<784x128xbf16, #tpu.memory_space<vmem>>, vector<784x128xbf16>
    %cst = arith.constant dense<0.000000e+00> : vector<16x128xf32>
    %2 = tpu.matmul %0, %1, %cst {dimension_numbers = #tpu.dot_dimension_numbers<[1], [0], [0], [1], [0, 0, 1, 1], [], []>} : vector<16x784xbf16>, vector<784x128xbf16>, vector<16x128xf32> -> vector<16x128xf32>
    %c0_3 = arith.constant 0 : index
    %c0_4 = arith.constant 0 : index
    %3 = vector.load %arg3[%c0_3, %c0_4] : memref<1x128xf32, #tpu.memory_space<vmem>>, vector<1x128xf32>
    %4 = vector.broadcast %3 : vector<1x128xf32> to vector<16x128xf32>
    %5 = arith.addf %2, %4 : vector<16x128xf32>
    %c0_5 = arith.constant 0 : index
    %c0_6 = arith.constant 0 : index
    %6 = vector.load %arg4[%c0_5, %c0_6] : memref<16x128xf32, #tpu.memory_space<vmem>>, vector<16x128xf32>
    tpu.vector_store %arg4[%c0_5, %c0_6], %5 {strides = array<i32>} : memref<16x128xf32, #tpu.memory_space<vmem>>, vector<16x128xf32>,
    return
  }
  func.func @transform_0(%arg0: i32) -> (i32, i32) {
    %c0_i32 = arith.constant 0 : i32
    %c0_i32_0 = arith.constant 0 : i32
    return %arg0, %c0_i32 : i32, i32
  }
  func.func @transform_1(%arg0: i32) -> (i32, i32) {
    %c0_i32 = arith.constant 0 : i32
    %c0_i32_0 = arith.constant 0 : i32
    %c0_i32_1 = arith.constant 0 : i32
    return %c0_i32, %c0_i32_0 : i32, i32
  }
  func.func @transform_2(%arg0: i32) -> (i32, i32) {
    %c0_i32 = arith.constant 0 : i32
    %c0_i32_0 = arith.constant 0 : i32
    %c0_i32_1 = arith.constant 0 : i32
    return %c0_i32, %c0_i32_0 : i32, i32
  }
  func.func @transform_3(%arg0: i32) -> (i32, i32) {
    %c0_i32 = arith.constant 0 : i32
    %c0_i32_0 = arith.constant 0 : i32
    return %arg0, %c0_i32 : i32, i32
  }
}

</mosaic_0001>

<bundles_post_ra>
// kernel: tpu_custom_call.1
= control target key start
LH: loop header
LB: loop body
LE: loop exit
PB: predicated region body
PF: predicated region fallthrough
CT: control target
= control target key end

     0   :  { %8 = vsyncpa [#allocation3], 0  ;;  %s1018_s0 = inlined_call_operand.hbm [shape: bf16[16,784], index: 0, kind: input, shape index: {}]   ;;  %s1019_s1 = inlined_call_operand.hbm [shape: bf16[784,128], index: 1, kind: input, shape index: {}]   ;;  %s1020_s2 = inlined_call_operand.vmem [shape: f32[1,128], index: 2, kind: input, shape index: {}]   ;;  %s1021_s3 = inlined_call_operand.hbm [shape: f32[16,128], index: 3, kind: output, shape index: {}]  }
   0x1   :  { %9 = vsyncpa [#allocation6], 0 }
   0x2   :  { %10 = vsyncpa [#allocation4], 0  ;;  %s948_s12 = smov [#allocation2]   ;;  %s876_s16 = scalar_lea.hbm %s1018_s0, 896 }
   0x3   :  { %s16_s13 = sshll.u32 %s948_s12, 4  ;;  %p877_p0 = scmp.ne.s32.totalorder %s1018_s0, %s876_s16  ;;  %s17_s13 = int_to_ptr.vmem [resolvable:$true] %s16_s13 }
   0x4   :  { %p880_p1 = scmp.lt.u32.totalorder %s876_s16, %s1018_s0 }
   0x6   :  { %p882_p2 = pnand %p880_p1, %p877_p0 }
   0x8   :  { %885 = shalt.err (!%p882_p2)
}
   0x9   :  { %s886_s21 = scalar_lea.vmem %s17_s13, 896  ;;  %p891_p4 = scmp.lt.s32.totalorder %s17_s13, %s17_s13 }
   0xa   :  { %p887_p3 = scmp.ne.s32.totalorder %s17_s13, %s886_s21  ;;  %p892_p5 = scmp.lt.s32.totalorder %s886_s21, %s886_s21 }
   0xc   :  { %p893_p6 = por %p892_p5, %p891_p4 }
   0xe   :  { %p894_p7 = pnand %p893_p6, %p887_p3 }
  0x10   :  { %897 = shalt.err (!%p894_p7)
}
  0x11   :  { %s949_s22 = smov 448   ;;  %s950_s23 = smov 28  }
  0x12   :  { %22 = dma.hbm_to_vmem [thread:$0]  %s1018_s0, 896, %s17_s13, [#allocation3], %s949_s22, %s949_s22, %s950_s23  }
  0x13   :  { %s951_s26 = smov [#allocation5]   ;;  %s898_s30 = scalar_lea.hbm %s1019_s1, 6272 }
  0x14   :  { %s28_s27 = sshll.u32 %s951_s26, 4  ;;  %p899_p8 = scmp.ne.s32.totalorder %s1019_s1, %s898_s30  ;;  %s29_s27 = int_to_ptr.vmem [resolvable:$true] %s28_s27 }
  0x15   :  { %p902_p9 = scmp.lt.u32.totalorder %s898_s30, %s1019_s1 }
  0x17   :  { %p904_p10 = pnand %p902_p9, %p899_p8 }
  0x19   :  { %907 = shalt.err (!%p904_p10)
}
  0x1a   :  { %s908_s8 = scalar_lea.vmem %s29_s27, 6272  ;;  %p913_p12 = scmp.lt.s32.totalorder %s29_s27, %s29_s27 }
  0x1b   :  { %p909_p11 = scmp.ne.s32.totalorder %s29_s27, %s908_s8  ;;  %p914_p13 = scmp.lt.s32.totalorder %s908_s8, %s908_s8 }
  0x1d   :  { %p915_p0 = por %p914_p13, %p913_p12 }
  0x1f   :  { %p916_p1 = pnand %p915_p0, %p909_p11 }
  0x21   :  { %919 = shalt.err (!%p916_p1)
}
  0x22   :  { %s952_s0 = smov 64   ;;  %s953_s9 = smov 4  }
  0x23   :  { %34 = dma.hbm_to_vmem [thread:$0]  %s1019_s1, 6272, %s29_s27, [#allocation6], %s952_s0, %s952_s0, %s953_s9  }
  0x24   :  { %942 = dma.done.wait [#allocation3], 896  }
  0x25   :  { %943 = vsyncadd [#allocation3], 4294966400 }
  0x26   :  { %944 = dma.done.wait [#allocation6], 6272  }
  0x27   :  { %945 = vsyncadd [#allocation6], 4294961024  ;;  %v817_v0 = vld [vmem:[#allocation5 + $0x40] sm:$0xff]   ;;  %v821_v4 = vld [vmem:[#allocation5 + $0x48] sm:$0xff]   ;;  %v954_v38 = vmov 0.0   ;;  %vm955_vm0 = vmmov 0  }
  0x28   :  { %v818_v1 = vld [vmem:[#allocation5] sm:$0xff]   ;;  %732 = vmatprep.subr.bf16.mxu0 %v817_v0  ;;  %v822_v5 = vld [vmem:[#allocation5 + $0x8] sm:$0xff]   ;;  %v825_v8 = vld [vmem:[#allocation5 + $0x50] sm:$0xff]   ;;  %vm486_vm1 = vcmask 130048  }
  0x29   :  { %v819_v2 = vld [vmem:[#allocation5 + $0xc0] sm:$0xff]   ;;  %733 = vmatpush3.bf16.msra.mxu0 %v818_v1  ;;  %v823_v6 = vld [vmem:[#allocation5 + $0xc8] sm:$0xff]   ;;  %v826_v9 = vld [vmem:[#allocation5 + $0x10] sm:$0xff]  }
  0x2a   :  { %v820_v3 = vld [vmem:[#allocation5 + $0x80] sm:$0xff]   ;;  %754 = vmatprep.subr.bf16.mxu1 %v819_v2  ;;  %734 = vmatprep.subr.bf16.mxu0 %v821_v4  ;;  %v824_v7 = vld [vmem:[#allocation5 + $0x88] sm:$0xff]   ;;  %v827_v10 = vld [vmem:[#allocation5 + $0xd0] sm:$0xff]  }
  0x2b   :  { %755 = vmatpush3.bf16.msra.mxu1 %v820_v3  ;;  %v828_v11 = vld [vmem:[#allocation5 + $0x90] sm:$0xff]   ;;  %v829_v12 = vld [vmem:[#allocation5 + $0x58] sm:$0xff]   ;;  %v833_v16 = vld [vmem:[#allocation5 + $0x60] sm:$0xff]  }
  0x2c   :  { %756 = vmatprep.subr.bf16.mxu1 %v823_v6  ;;  %v830_v13 = vld [vmem:[#allocation5 + $0x18] sm:$0xff]   ;;  %v834_v17 = vld [vmem:[#allocation5 + $0x20] sm:$0xff]   ;;  %v837_v20 = vld [vmem:[#allocation5 + $0x68] sm:$0xff]  }
  0x2d   :  { %735 = vmatpush3.bf16.msra.mxu0 %v822_v5  ;;  %v831_v14 = vld [vmem:[#allocation5 + $0xd8] sm:$0xff]   ;;  %v835_v18 = vld [vmem:[#allocation5 + $0xe0] sm:$0xff]   ;;  %v838_v21 = vld [vmem:[#allocation5 + $0x28] sm:$0xff]  }
  0x2e   :  { %736 = vmatprep.subr.bf16.mxu0 %v825_v8  ;;  %v832_v15 = vld [vmem:[#allocation5 + $0x98] sm:$0xff]   ;;  %v836_v19 = vld [vmem:[#allocation5 + $0xa0] sm:$0xff]   ;;  %v839_v22 = vld [vmem:[#allocation5 + $0xe8] sm:$0xff]  }
  0x2f   :  { %757 = vmatpush3.bf16.msra.mxu1 %v824_v7  ;;  %v840_v23 = vld [vmem:[#allocation5 + $0xa8] sm:$0xff]   ;;  %v841_v24 = vld [vmem:[#allocation5 + $0x70] sm:$0xff]   ;;  %v845_v28 = vld [vmem:[#allocation5 + $0x78] sm:$0xff]  }
  0x30   :  { %758 = vmatprep.subr.bf16.mxu1 %v827_v10  ;;  %v842_v25 = vld [vmem:[#allocation5 + $0x30] sm:$0xff]   ;;  %v846_v29 = vld [vmem:[#allocation5 + $0x38] sm:$0xff]   ;;  %v848_v31 = vld [vmem:[#allocation2] ss:$28 sps:$4 sm:$0xff]  }
  0x31   :  { %737 = vmatpush3.bf16.msra.mxu0 %v826_v9  ;;  %v843_v26 = vld [vmem:[#allocation5 + $0xf0] sm:$0xff]   ;;  %v847_v30 = vld [vmem:[#allocation5 + $0xf8] sm:$0xff]   ;;  %v850_v32 = vld [vmem:[#allocation2 + $0x4] ss:$28 sps:$4 sm:$0xff]  }
  0x32   :  { %738 = vmatprep.subr.bf16.mxu0 %v829_v12  ;;  %v844_v27 = vld [vmem:[#allocation5 + $0xb0] sm:$0xff]   ;;  %v851_v33 = vld [vmem:[#allocation5 + $0xb8] sm:$0xff]   ;;  %522 = vmatprep.mubr.bf16.mxu0 %v850_v32  ;;  %v852_v34 = vld [vmem:[#allocation5 + $0x140] sm:$0xff]  }
  0x33   :  { %759 = vmatpush3.bf16.msra.mxu1 %v828_v11  ;;  %v853_v35 = vld [vmem:[#allocation2 + $0x8] ss:$28 sps:$4 sm:$0xff]   ;;  %v856_v37 = vld [vmem:[#allocation5 + $0x100] sm:$0xff]   ;;  %v861_v43 = vld [vmem:[#allocation5 + $0x158] sm:$0xff]  }
  0x34   :  { %760 = vmatprep.subr.bf16.mxu1 %v831_v14  ;;  %v855_v36 = vld [vmem:[#allocation2 + $0xc] ss:$28 sps:$4 sm:$0xff]   ;;  %v857_v39 = vld [vmem:[#allocation5 + $0x148] sm:$0xff]   ;;  %v862_v44 = vld [vmem:[#allocation5 + $0x118] sm:$0xff]  }
  0x35   :  { %739 = vmatpush3.bf16.msra.mxu0 %v830_v13  ;;  %563 = vmatprep.mubr.bf16.mxu1 %v855_v36  ;;  %v858_v40 = vld [vmem:[#allocation5 + $0x108] sm:$0xff]   ;;  %v859_v41 = vld [vmem:[#allocation5 + $0x150] sm:$0xff]   ;;  %v863_v45 = vld [vmem:[#allocation5 + $0x160] sm:$0xff]  }
  0x36   :  { %740 = vmatprep.subr.bf16.mxu0 %v833_v16  ;;  %v860_v42 = vld [vmem:[#allocation5 + $0x110] sm:$0xff]   ;;  %v864_v46 = vld [vmem:[#allocation5 + $0x120] sm:$0xff]   ;;  %v865_v47 = vld [vmem:[#allocation5 + $0x168] sm:$0xff]  }
  0x37   :  { %761 = vmatpush3.bf16.msra.mxu1 %v832_v15  ;;  %v871_v48 = vld [vmem:[#allocation5 + $0x180] sm:$0xff]   ;;  %v874_v49 = vld [vmem:[#allocation2 + $0x14] ss:$28 sps:$4 sm:$0xff]   ;;  %v866_v51 = vld [vmem:[#allocation5 + $0x128] sm:$0xff]  }
  0x38   :  { %762 = vmatprep.subr.bf16.mxu1 %v835_v18  ;;  %v875_v50 = vld [vmem:[#allocation2 + $0x18] ss:$28 sps:$4 sm:$0xff]   ;;  %v867_v52 = vld [vmem:[#allocation5 + $0x170] sm:$0xff]   ;;  %v674_v58 = vld [vmem:[%s1020_s2] ss:$0 sm:$0xff]  ;;  %s956_s2 = smov [#allocation7]  }
  0x39   :  { %741 = vmatpush3.bf16.msra.mxu0 %v834_v17  ;;  %v868_v53 = vld [vmem:[#allocation5 + $0x130] sm:$0xff]   ;;  %v869_v54 = vld [vmem:[#allocation5 + $0x178] sm:$0xff]   ;;  %s661_s13 = sshll.u32 %s956_s2, 4  ;;  %s662_s13 = int_to_ptr.vmem [resolvable:$true] %s661_s13 }
  0x3a   :  { %742 = vmatprep.subr.bf16.mxu0 %v837_v20  ;;  %v870_v55 = vld [vmem:[#allocation5 + $0x138] sm:$0xff]   ;;  %s920_s14 = scalar_lea.vmem %s662_s13, 256  ;;  %p925_p3 = scmp.lt.s32.totalorder %s662_s13, %s662_s13 }
  0x3b   :  { %763 = vmatpush3.bf16.msra.mxu1 %v836_v19  ;;  %v872_v56 = vld [vmem:[#allocation2 + $0x10] ss:$28 sps:$4 sm:$0xff]   ;;  %p921_p2 = scmp.ne.s32.totalorder %s662_s13, %s920_s14  ;;  %p926_p4 = scmp.lt.s32.totalorder %s920_s14, %s920_s14 }
  0x3c   :  { %764 = vmatprep.subr.bf16.mxu1 %v839_v22 }
  0x3d   :  { %743 = vmatpush3.bf16.msra.mxu0 %v838_v21  ;;  %p927_p5 = por %p926_p4, %p925_p3 }
  0x3e   :  { %744 = vmatprep.subr.bf16.mxu0 %v841_v24 }
  0x3f   :  { %765 = vmatpush3.bf16.msra.mxu1 %v840_v23  ;;  %p928_p6 = pnand %p927_p5, %p921_p2 }
  0x40   :  { %766 = vmatprep.subr.bf16.mxu1 %v843_v26 }
  0x41   :  { %745 = vmatpush3.bf16.msra.mxu0 %v842_v25 }
  0x42   :  { %746 = vmatprep.subr.bf16.mxu0 %v845_v28 }
  0x43   :  { %767 = vmatpush3.bf16.msra.mxu1 %v844_v27 }
  0x44   :  { %768 = vmatprep.subr.bf16.mxu1 %v847_v30 }
  0x45   :  { %747 = vmatpush3.bf16.msra.mxu0 %v846_v29 }
  0x46   :  { %776 = vmatprep.subr.bf16.mxu0 %v852_v34 }
  0x47   :  { %769 = vmatpush3.bf16.msra.mxu1 %v851_v33 }
  0x48   :  { %523 = vmatmul.mubr.bf16.vlgmr.msra.gmra.mrb[0].mxu0 %v848_v31  ;;  %800 = vmatprep.subr.bf16.mxu1 %v954_v38 }
  0x49   :  { %777 = vmatpush3.bf16.msra.mxu0 %v856_v37  ;;  %604 = vmatprep.mubr.bf16.mxu0 %v874_v49 }
  0x4a   :  { %564 = vmatmul.mubr.bf16.vlgmr.msra.gmra.mrb[0].mxu1 %v853_v35  ;;  %778 = vmatprep.subr.bf16.mxu0 %v857_v39 }
  0x4b   :  { %802 = vmatprep.mubr.msk.bf16.mxu1 %vm955_vm0, %v954_v38  ;;  %801 = vmatpush3.bf16.msra.mxu1 %v871_v48 }
  0x4d   :  { %779 = vmatpush3.bf16.msra.mxu0 %v858_v40 }
  0x4e   :  { %780 = vmatprep.subr.bf16.mxu0 %v859_v41 }
  0x51   :  { %781 = vmatpush3.bf16.msra.mxu0 %v860_v42 }
  0x52   :  { %782 = vmatprep.subr.bf16.mxu0 %v861_v43  ;;  %803 = vmatmul.mubr.msk.bf16.vlgmr.msra.gmra.mrb[4].mxu1 %vm486_vm1, %v875_v50 }
  0x55   :  { %783 = vmatpush3.bf16.msra.mxu0 %v862_v44 }
  0x56   :  { %784 = vmatprep.subr.bf16.mxu0 %v863_v45 }
  0x59   :  { %785 = vmatpush3.bf16.msra.mxu0 %v864_v46 }
  0x5a   :  { %786 = vmatprep.subr.bf16.mxu0 %v865_v47 }
  0x5d   :  { %787 = vmatpush3.bf16.msra.mxu0 %v866_v51 }
  0x5e   :  { %788 = vmatprep.subr.bf16.mxu0 %v867_v52 }
  0x61   :  { %789 = vmatpush3.bf16.msra.mxu0 %v868_v53 }
  0x62   :  { %790 = vmatprep.subr.bf16.mxu0 %v869_v54 }
  0x65   :  { %791 = vmatpush3.bf16.msra.mxu0 %v870_v55 }
  0x68   :  { %605 = vmatmul.mubr.bf16.vlgmr.msra.gmra.mrb[4].mxu0 %v872_v56 }
 0x11b   :  { %v748_v57 = vpop.f32.mrb[0].mxu0 }
 0x11c   :  { %v749_v59 = vpop.f32.mrb[1].mxu0 }
 0x11d   :  { %v750_v60 = vadd.f32 %v749_v59, %v748_v57  ;;  %v751_v61 = vpop.f32.mrb[2].mxu0  ;;  %v770_v62 = vpop.f32.mrb[0].mxu1 }
 0x11e   :  { %v752_v63 = vpop.f32.mrb[3].mxu0  ;;  %v771_v2 = vpop.f32.mrb[1].mxu1 }
 0x11f   :  { %v525_v0 = vadd.f32 %v750_v60, %v674_v58  ;;  %v753_v1 = vadd.f32 %v752_v63, %v751_v61  ;;  %v772_v3 = vadd.f32 %v771_v2, %v770_v62  ;;  %v773_v4 = vpop.f32.mrb[2].mxu1 }
 0x120   :  { %v774_v6 = vpop.f32.mrb[3].mxu1 }
 0x121   :  { %v528_v5 = vadd.f32 %v753_v1, %v674_v58  ;;  %v566_v7 = vadd.f32 %v772_v3, %v525_v0  ;;  %v775_v8 = vadd.f32 %v774_v6, %v773_v4 }
 0x123   :  { %v569_v9 = vadd.f32 %v775_v8, %v528_v5 }
 0x125   :  { %v647_v10 = vpop.f32.mrb[4].mxu1 }
 0x126   :  { %v804_v11 = vpop.f32.mrb[5].mxu1 }
 0x127   :  { %v650_v12 = vpop.f32.mrb[6].mxu1 }
 0x128   :  { %v805_v13 = vpop.f32.mrb[7].mxu1 }
 0x13b   :  { %v792_v14 = vpop.f32.mrb[4].mxu0 }
 0x13c   :  { %v793_v15 = vpop.f32.mrb[5].mxu0 }
 0x13d   :  { %v794_v16 = vadd.f32 %v793_v15, %v792_v14  ;;  %v795_v17 = vpop.f32.mrb[6].mxu0 }
 0x13e   :  { %v796_v18 = vpop.f32.mrb[7].mxu0 }
 0x13f   :  { %v607_v19 = vadd.f32 %v794_v16, %v566_v7  ;;  %v797_v20 = vadd.f32 %v796_v18, %v795_v17 }
 0x141   :  { %v648_v21 = vadd.f32 %v647_v10, %v607_v19  ;;  %v610_v22 = vadd.f32 %v797_v20, %v569_v9 }
 0x143   :  { %654 = vst [vmem:[#allocation7] sm:$0xff] %v648_v21  ;;  %v651_v23 = vadd.f32 %v650_v12, %v610_v22 }
 0x145   :  { %655 = vst [vmem:[#allocation7 + $0x8] sm:$0xff] %v651_v23 }
 0x146   :  { %931 = shalt.err (!%p928_p6)
}
 0x147   :  { %s932_s17 = scalar_lea.hbm %s1021_s3, 256 }
 0x148   :  { %p933_p7 = scmp.ne.s32.totalorder %s1021_s3, %s932_s17  ;;  %p936_p8 = scmp.lt.u32.totalorder %s932_s17, %s1021_s3 }
 0x14a   :  { %p938_p9 = pnand %p936_p8, %p933_p7 }
 0x14c   :  { %941 = shalt.err (!%p938_p9)
}
 0x14d   :  { %s957_s22 = smov 128   ;;  %s958_s23 = smov 8  }
 0x14e   :  { %667 = dma.vmem_to_hbm [thread:$0]  %s662_s13, 256, %s1021_s3, [#allocation4], %s957_s22, %s957_s22, %s958_s23  }
 0x14f   :  { %946 = dma.done.wait [#allocation4], 256  }
 0x150   :  { %947 = vsyncadd [#allocation4], 4294967040 }
 0x151   :  { %671 = vsyncpa [#allocation3], 1 }
 0x152   :  { %672 = vsyncpa [#allocation6], 1 }
 0x153   :  { %673 = vsyncpa [#allocation4], 1 }

</bundles_post_ra>
